<compile_context>
chip_gen: v5e
topology: v5e:2x2
jax: 0.10.0
libtpu: 0.0.40
codegen_flags: <defaults>
</compile_context>

<pallas_src>
import functools

import jax
import jax.numpy as jnp
from jax.experimental import pallas as pl
from jax.experimental.pallas import tpu as pltpu


# ----------------------------------------------------------------------------- kernel


def gtn_kernel(a_ref, x_ref, convw_ref, w_ref,
               w1_ref, b1_ref, w2_ref, b2_ref,
               rsel_ref, csel_ref, eyet_ref,
               tx_ref, tg_ref,
               ylo_ref, sw_ref,
               *, num_layers, num_channels, n_nodes, n_target):
    C, N, T = num_channels, n_nodes, n_target
    F = w_ref.shape[1]                       # w_out
    f32 = jnp.float32

    # (N, N) diagonal masks, built once (pure iota / VPU, no transposes anywhere).
    row = jax.lax.broadcasted_iota(jnp.int32, (N, N), 0)
    col = jax.lax.broadcasted_iota(jnp.int32, (N, N), 1)
    eye = (row == col).astype(f32)
    off_diag = 1.0 - eye

    def col_norm(h, add):
        """GTN.norm, transpose-free: zero diag (+I), scale COLUMNS by 1/colsum.

        (Identical to torch's t()/row-normalize/t().)  The exact `deg == 0` compare is
        safe here because A >= 0 and the softmaxed conv weights are > 0, so a column sum
        is 0 only when the whole column is 0 (matches torch's inf -> 0 handling).
        """
        hm = h * off_diag
        if add:
            hm = hm + eye
        deg = jnp.sum(hm, axis=0, keepdims=True)                       # (1, N)
        deg_inv = jnp.where(deg == 0.0, 0.0, pl.reciprocal(deg, approx=True))
        return hm * deg_inv

    # ---------------------------------------------------------------- 1) softmax of ALL
    # GTConv weights over the edge axis at once (S*C, E); divide -> EUP reciprocal.
    w = convw_ref[...]
    m = jnp.max(w, axis=1, keepdims=True)
    e = jnp.exp(w - m)
    sw = e * pl.reciprocal(jnp.sum(e, axis=1, keepdims=True), approx=True)
    sw_ref[...] = sw

    # ---------------------------------------------------------------- 2) all weighted
    # adjacencies with ONE MXU contraction over the edge axis:
    #   wa[(j*C+c)*N + n, m] = sum_e sw[j*C+c, e] * A[e, n, m]
    # encoded as  wa = kron(sw, I_N) @ A_rowstacked, with
    #   kron(sw, I_N) = (rsel @ sw @ csel) * eye_tiled   (rsel/csel/eye_tiled constants).
    big = jnp.dot(jnp.dot(rsel_ref[...], sw, preferred_element_type=f32),
                  csel_ref[...], preferred_element_type=f32) * eyet_ref[...]
    wa = jnp.dot(big, a_ref[...], preferred_element_type=f32)          # (S*C*N, N)

    def wa_block(j, c):                                                # static row slice
        s = (j * C + c) * N
        return wa[s:s + N, :]

    # ---------------------------------------------------------------- 3) GT layers
    # (per-channel 2-D MXU dots; C is tiny so this stays fully unrolled).
    H = [jnp.dot(wa_block(0, c), wa_block(1, c), preferred_element_type=f32)
         for c in range(C)]
    for layer in range(1, num_layers):
        H = [jnp.dot(col_norm(H[c], add=False), wa_block(1 + layer, c),
                     preferred_element_type=f32)
             for c in range(C)]

    # ---------------------------------------------------------------- 4) GCN, fused over
    # channels: one dot produces the whole (C*N, F) slab (no per-channel matmuls, no
    # lane-offset partial stores).  hn^T @ xw is expressed as contraction of axis 0 of
    # both operands -> no (N, N) transpose is materialized.
    xw = jnp.dot(x_ref[...], w_ref[...], preferred_element_type=f32)   # (N, F), once
    hn_cat = jnp.concatenate([col_norm(H[c], add=True) for c in range(C)], axis=1)
    slab = jax.lax.dot_general(hn_cat, xw, (((0,), (0,)), ((), ())),
                               preferred_element_type=f32)             # (C*N, F)
    slab = jnp.maximum(slab, 0.0)

    # ---------------------------------------------------------------- 5) target-row
    # gather via a one-hot selection matmul (no serialized dynamic-slice copies).
    sel = (jax.lax.broadcasted_iota(jnp.int32, (T, N), 1) == tx_ref[...]).astype(f32)
    xg = jnp.concatenate(
        [jnp.dot(sel, slab[c * N:(c + 1) * N, :], preferred_element_type=f32)
         for c in range(C)], axis=1)                                    # (T, C*F)

    # ---------------------------------------------------------------- 6) MLP (target rows
    # only; linear1/relu are row-wise so gathering first is exact).
    h1 = jnp.maximum(
        jnp.dot(xg, w1_ref[...], preferred_element_type=f32) + b1_ref[...], 0.0)
    y = jnp.dot(h1, w2_ref[...], preferred_element_type=f32) + b2_ref[...]   # (T, K)

    # ---------------------------------------------------------------- 7) cross-entropy
    # (mean), fully vectorized: one-hot mask instead of a per-row loop.
    K = y.shape[1]
    my = jnp.max(y, axis=1, keepdims=True)
    lse = jnp.log(jnp.sum(jnp.exp(y - my), axis=1, keepdims=True)) + my      # (T, 1)
    onehot = (jax.lax.broadcasted_iota(jnp.int32, (T, K), 1) == tg_ref[...]).astype(f32)
    picked = jnp.sum(onehot * y, axis=1, keepdims=True)                      # (T, 1)
    loss = jnp.sum(lse - picked, axis=0, keepdims=True) * (1.0 / T)          # (1, 1)

    # ---------------------------------------------------------------- 8) packed output:
    # rows 0..T-1 = logits, row T = loss (one writeback instead of two).
    ylo_ref[...] = jnp.concatenate([y, jnp.broadcast_to(loss, (1, K))], axis=0)


# ----------------------------------------------------------------------------- forward


def gtn_forward(params, A_enn, X, target_x, target):
    """A_enn: (E, N, N) edge-major (prepared at data-prep time), X: (N, w_in),
    target_x/target: (T,) int -> (loss, y, Ws)."""
    E, N, _ = A_enn.shape
    T = int(target_x.shape[0])
    num_layers = len(params["layers"])

    conv_list = [params["layers"][0]["conv1"], params["layers"][0]["conv2"]]
    for i in range(1, num_layers):
        conv_list.append(params["layers"][i]["conv1"])
    conv_stack = jnp.concatenate([c.astype(jnp.float32) for c in conv_list], axis=0)
    SC = conv_stack.shape[0]                                            # (= num_layers + 1) * ... rows
    C = int(params["layers"][0]["conv1"].shape[0])
    w_in, w_out = params["weight"].shape
    K = int(params["w2"].shape[1])

    # Row-stacked adjacency (free, row-major reshape of the edge-major array).
    a_rows = A_enn.astype(jnp.float32).reshape(E * N, N)

    # Kronecker-expansion selector constants (trace-time; XLA constant-folds them):
    #   rows_sel[r, s]  = (r // N == s)          (R, SC)
    #   cols_sel[e, q]  = (e == q // N)          (E, Q)
    #   eye_tiled[r, q] = (r % N == q % N)       (R, Q)
    R, Q = SC * N, E * N
    ir = jnp.arange(R, dtype=jnp.int32)
    iq = jnp.arange(Q, dtype=jnp.int32)
    rows_sel = ((ir // N)[:, None] == jnp.arange(SC, dtype=jnp.int32)[None, :]).astype(jnp.float32)
    cols_sel = (jnp.arange(E, dtype=jnp.int32)[:, None] == (iq // N)[None, :]).astype(jnp.float32)
    eye_tiled = ((ir % N)[:, None] == (iq % N)[None, :]).astype(jnp.float32)

    kernel = functools.partial(
        gtn_kernel, num_layers=num_layers, num_channels=C, n_nodes=N, n_target=T)

    # Advisory cost estimate (rough).
    flops = 2 * (R * SC * E + R * E * Q + R * Q * N
                 + num_layers * C * N * N * N
                 + N * w_in * w_out + C * N * N * w_out
                 + T * N * C * w_out + T * C * w_out * w_out + T * w_out * K)
    transcendentals = SC * E + SC + T * K + T + (num_layers + 1) * C * N
    bytes_accessed = 4 * (E * N * N + N * w_in + SC * E + w_in * w_out
                          + C * w_out * w_out + w_out + w_out * K + K
                          + R * SC + E * Q + R * Q + 2 * T + (T + 1) * K + SC * E)

    ylo, sw = pl.pallas_call(
        kernel,
        out_shape=(jax.ShapeDtypeStruct((T + 1, K), jnp.float32),       # logits + loss row
                   jax.ShapeDtypeStruct((SC, E), jnp.float32)),         # softmaxed conv weights
        compiler_params=pltpu.CompilerParams(vmem_limit_bytes=32 * 1024 * 1024),
        cost_estimate=pl.CostEstimate(flops=flops, transcendentals=transcendentals,
                                      bytes_accessed=bytes_accessed),
    )(a_rows, X.astype(jnp.float32), conv_stack,
      params["weight"].astype(jnp.float32),
      params["w1"], params["b1"].reshape(1, -1),
      params["w2"], params["b2"].reshape(1, -1),
      rows_sel, cols_sel, eye_tiled,
      target_x.reshape(T, 1).astype(jnp.int32), target.reshape(T, 1).astype(jnp.int32))

    y = ylo[:T, :]
    loss = ylo[T, 0]
    sw3 = sw.reshape(num_layers + 1, C, E)
    Ws = [[sw3[0], sw3[1]]] + [[sw3[1 + i]] for i in range(1, num_layers)]
    return loss, y, Ws


# ----------------------------------------------------------------------------- params / main


def make_params(key, num_edge, num_channels, w_in, w_out, num_class, num_layers):
    ks = jax.random.split(key, 4 + 2 * num_layers)
    layers = []
    k_idx = 4
    for i in range(num_layers):
        if i == 0:
            layers.append({
                "conv1": 0.1 * jax.random.normal(ks[k_idx], (num_channels, num_edge), jnp.float32),
                "conv2": 0.1 * jax.random.normal(ks[k_idx + 1], (num_channels, num_edge), jnp.float32),
            })
            k_idx += 2
        else:
            layers.append({
                "conv1": 0.1 * jax.random.normal(ks[k_idx], (num_channels, num_edge), jnp.float32),
            })
            k_idx += 1
    bound1 = 1.0 / jnp.sqrt(w_out * num_channels)
    bound2 = 1.0 / jnp.sqrt(w_out)
    params = {
        "layers": layers,
        # GTN.weight (w_in, w_out)
        "weight": jax.random.uniform(ks[0], (w_in, w_out), jnp.float32, -0.2, 0.2),
        # linear1 / linear2 stored as (in, out) so the kernel does X @ W + b
        "w1": jax.random.uniform(ks[1], (w_out * num_channels, w_out), jnp.float32, -bound1, bound1),
        "b1": jnp.zeros((w_out,), jnp.float32),
        "w2": jax.random.uniform(ks[2], (w_out, num_class), jnp.float32, -bound2, bound2),
        "b2": jnp.zeros((num_class,), jnp.float32),
    }
    return params


if __name__ == "__main__":
    # small synthetic problem
    N = 16            # number of nodes
    num_edge = 5      # edge types (in_channels of GTConv)
    num_channels = 2  # out_channels of GTConv
    w_in = 32
    w_out = 16
    num_class = 4
    num_layers = 2

    key = jax.random.PRNGKey(0)
    k_a, k_x, k_p = jax.random.split(key, 3)

    A = jax.random.uniform(k_a, (N, N, num_edge), jnp.float32)          # adjacency stack
    X = jax.random.normal(k_x, (N, w_in), jnp.float32)                  # node features
    target_x = jnp.array([0, 3, 7, 11], dtype=jnp.int32)
    target = jnp.array([0, 1, 2, 3], dtype=jnp.int32)

    params = make_params(k_p, num_edge, num_channels, w_in, w_out, num_class, num_layers)

    # Data prep (outside the jitted forward, per review): edge-major adjacency, once.
    A_enn = jnp.transpose(A, (2, 0, 1))                                 # (E, N, N)

    fwd = jax.jit(gtn_forward)
    loss, y, Ws = fwd(params, A_enn, X, target_x, target)
    jax.block_until_ready(loss)
    jax.block_until_ready(y)

    assert y.shape == (target_x.shape[0], num_class)
    assert loss.shape == ()
    assert len(Ws) == num_layers and len(Ws[0]) == 2 and len(Ws[1]) == 1
    print("KERNEL_OK")
</pallas_src>

<mosaic_0001>
module attributes {stable_mosaic.version = 11 : i64} {
  func.func @gtn_kernel(%arg0: memref<80x16xf32, #tpu.memory_space<vmem>>, %arg1: memref<16x32xf32, #tpu.memory_space<vmem>>, %arg2: memref<6x5xf32, #tpu.memory_space<vmem>>, %arg3: memref<32x16xf32, #tpu.memory_space<vmem>>, %arg4: memref<32x16xf32, #tpu.memory_space<vmem>>, %arg5: memref<1x16xf32, #tpu.memory_space<vmem>>, %arg6: memref<16x4xf32, #tpu.memory_space<vmem>>, %arg7: memref<1x4xf32, #tpu.memory_space<vmem>>, %arg8: memref<96x6xf32, #tpu.memory_space<vmem>>, %arg9: memref<5x80xf32, #tpu.memory_space<vmem>>, %arg10: memref<96x80xf32, #tpu.memory_space<vmem>>, %arg11: memref<4x1xi32, #tpu.memory_space<vmem>>, %arg12: memref<4x1xi32, #tpu.memory_space<vmem>>, %arg13: memref<5x4xf32, #tpu.memory_space<vmem>>, %arg14: memref<6x5xf32, #tpu.memory_space<vmem>>) attributes {dimension_semantics = [], scalar_prefetch = 0 : i64, scratch_operands = 0 : i64, tpu.core_type = #tpu.core_type<tc>} {
    %0 = tpu.iota {dimensions = array<i32: 0>} : vector<16x16xi32>
    %1 = tpu.iota {dimensions = array<i32: 1>} : vector<16x16xi32>
    %2 = arith.cmpi eq, %0, %1 : vector<16x16xi32>
    %3 = arith.extui %2 : vector<16x16xi1> to vector<16x16xi32>
    %4 = arith.sitofp %3 : vector<16x16xi32> to vector<16x16xf32>
    %cst = arith.constant 1.000000e+00 : f32
    %5 = vector.broadcast %cst : f32 to vector<16x16xf32>
    %6 = arith.subf %5, %4 : vector<16x16xf32>
    %c0 = arith.constant 0 : index
    %c0_0 = arith.constant 0 : index
    %7 = vector.load %arg2[%c0, %c0_0] : memref<6x5xf32, #tpu.memory_space<vmem>>, vector<6x5xf32>
    %cst_1 = arith.constant dense<0xFF800000> : vector<6xf32>
    %8 = vector.multi_reduction <maximumf>, %7, %cst_1 [1] : vector<6x5xf32> to vector<6xf32>
    %9 = vector.shape_cast %8 : vector<6xf32> to vector<6x1xf32>
    %10 = vector.broadcast %9 : vector<6x1xf32> to vector<6x5xf32>
    %11 = arith.subf %7, %10 : vector<6x5xf32>
    %12 = math.exp %11 : vector<6x5xf32>
    %cst_2 = arith.constant dense<0.000000e+00> : vector<6xf32>
    %13 = vector.multi_reduction <add>, %12, %cst_2 [1] : vector<6x5xf32> to vector<6xf32>
    %14 = vector.shape_cast %13 : vector<6xf32> to vector<6x1xf32>
    %15 = tpu.reciprocal %14 {approx = true} : vector<6x1xf32> -> vector<6x1xf32>
    %16 = vector.broadcast %15 : vector<6x1xf32> to vector<6x5xf32>
    %17 = arith.mulf %12, %16 : vector<6x5xf32>
    %c0_3 = arith.constant 0 : index
    %c0_4 = arith.constant 0 : index
    %18 = vector.load %arg14[%c0_3, %c0_4] : memref<6x5xf32, #tpu.memory_space<vmem>>, vector<6x5xf32>
    tpu.vector_store %arg14[%c0_3, %c0_4], %17 {strides = array<i32>} : memref<6x5xf32, #tpu.memory_space<vmem>>, vector<6x5xf32>,
    %c0_5 = arith.constant 0 : index
    %c0_6 = arith.constant 0 : index
    %19 = vector.load %arg8[%c0_5, %c0_6] : memref<96x6xf32, #tpu.memory_space<vmem>>, vector<96x6xf32>
    %cst_7 = arith.constant dense<0.000000e+00> : vector<96x5xf32>
    %20 = tpu.matmul %19, %17, %cst_7 {dimension_numbers = #tpu.dot_dimension_numbers<[1], [0], [0], [1], [0, 0, 1, 1], [], []>} : vector<96x6xf32>, vector<6x5xf32>, vector<96x5xf32> -> vector<96x5xf32>
    %c0_8 = arith.constant 0 : index
    %c0_9 = arith.constant 0 : index
    %21 = vector.load %arg9[%c0_8, %c0_9] : memref<5x80xf32, #tpu.memory_space<vmem>>, vector<5x80xf32>
    %cst_10 = arith.constant dense<0.000000e+00> : vector<96x80xf32>
    %22 = tpu.matmul %20, %21, %cst_10 {dimension_numbers = #tpu.dot_dimension_numbers<[1], [0], [0], [1], [0, 0, 1, 1], [], []>} : vector<96x5xf32>, vector<5x80xf32>, vector<96x80xf32> -> vector<96x80xf32>
    %c0_11 = arith.constant 0 : index
    %c0_12 = arith.constant 0 : index
    %23 = vector.load %arg10[%c0_11, %c0_12] : memref<96x80xf32, #tpu.memory_space<vmem>>, vector<96x80xf32>
    %24 = arith.mulf %22, %23 : vector<96x80xf32>
    %c0_13 = arith.constant 0 : index
    %c0_14 = arith.constant 0 : index
    %25 = vector.load %arg0[%c0_13, %c0_14] : memref<80x16xf32, #tpu.memory_space<vmem>>, vector<80x16xf32>
    %cst_15 = arith.constant dense<0.000000e+00> : vector<96x16xf32>
    %26 = tpu.matmul %24, %25, %cst_15 {dimension_numbers = #tpu.dot_dimension_numbers<[1], [0], [0], [1], [0, 0, 1, 1], [], []>} : vector<96x80xf32>, vector<80x16xf32>, vector<96x16xf32> -> vector<96x16xf32>
    %27 = vector.extract_strided_slice %26 {offsets = [0, 0], sizes = [16, 16], strides = [1, 1]} : vector<96x16xf32> to vector<16x16xf32>
    %28 = vector.extract_strided_slice %26 {offsets = [32, 0], sizes = [16, 16], strides = [1, 1]} : vector<96x16xf32> to vector<16x16xf32>
    %cst_16 = arith.constant dense<0.000000e+00> : vector<16x16xf32>
    %29 = tpu.matmul %27, %28, %cst_16 {dimension_numbers = #tpu.dot_dimension_numbers<[1], [0], [0], [1], [0, 0, 1, 1], [], []>} : vector<16x16xf32>, vector<16x16xf32>, vector<16x16xf32> -> vector<16x16xf32>
    %30 = vector.extract_strided_slice %26 {offsets = [16, 0], sizes = [16, 16], strides = [1, 1]} : vector<96x16xf32> to vector<16x16xf32>
    %31 = vector.extract_strided_slice %26 {offsets = [48, 0], sizes = [16, 16], strides = [1, 1]} : vector<96x16xf32> to vector<16x16xf32>
    %cst_17 = arith.constant dense<0.000000e+00> : vector<16x16xf32>
    %32 = tpu.matmul %30, %31, %cst_17 {dimension_numbers = #tpu.dot_dimension_numbers<[1], [0], [0], [1], [0, 0, 1, 1], [], []>} : vector<16x16xf32>, vector<16x16xf32>, vector<16x16xf32> -> vector<16x16xf32>
    %33 = arith.mulf %29, %6 : vector<16x16xf32>
    %cst_18 = arith.constant dense<0.000000e+00> : vector<16xf32>
    %34 = vector.multi_reduction <add>, %33, %cst_18 [0] : vector<16x16xf32> to vector<16xf32>
    %35 = vector.shape_cast %34 : vector<16xf32> to vector<1x16xf32>
    %cst_19 = arith.constant 0.000000e+00 : f32
    %36 = vector.broadcast %cst_19 : f32 to vector<1x16xf32>
    %37 = arith.cmpf oeq, %35, %36 : vector<1x16xf32>
    %38 = tpu.reciprocal %35 {approx = true} : vector<1x16xf32> -> vector<1x16xf32>
    %cst_20 = arith.constant 0.000000e+00 : f32
    %39 = vector.broadcast %cst_20 : f32 to vector<1x16xf32>
    %40 = arith.select %37, %39, %38 : vector<1x16xi1>, vector<1x16xf32>
    %41 = vector.broadcast %40 : vector<1x16xf32> to vector<16x16xf32>
    %42 = arith.mulf %33, %41 : vector<16x16xf32>
    %43 = vector.extract_strided_slice %26 {offsets = [64, 0], sizes = [16, 16], strides = [1, 1]} : vector<96x16xf32> to vector<16x16xf32>
    %cst_21 = arith.constant dense<0.000000e+00> : vector<16x16xf32>
    %44 = tpu.matmul %42, %43, %cst_21 {dimension_numbers = #tpu.dot_dimension_numbers<[1], [0], [0], [1], [0, 0, 1, 1], [], []>} : vector<16x16xf32>, vector<16x16xf32>, vector<16x16xf32> -> vector<16x16xf32>
    %45 = arith.mulf %32, %6 : vector<16x16xf32>
    %cst_22 = arith.constant dense<0.000000e+00> : vector<16xf32>
    %46 = vector.multi_reduction <add>, %45, %cst_22 [0] : vector<16x16xf32> to vector<16xf32>
    %47 = vector.shape_cast %46 : vector<16xf32> to vector<1x16xf32>
    %cst_23 = arith.constant 0.000000e+00 : f32
    %48 = vector.broadcast %cst_23 : f32 to vector<1x16xf32>
    %49 = arith.cmpf oeq, %47, %48 : vector<1x16xf32>
    %50 = tpu.reciprocal %47 {approx = true} : vector<1x16xf32> -> vector<1x16xf32>
    %cst_24 = arith.constant 0.000000e+00 : f32
    %51 = vector.broadcast %cst_24 : f32 to vector<1x16xf32>
    %52 = arith.select %49, %51, %50 : vector<1x16xi1>, vector<1x16xf32>
    %53 = vector.broadcast %52 : vector<1x16xf32> to vector<16x16xf32>
    %54 = arith.mulf %45, %53 : vector<16x16xf32>
    %55 = vector.extract_strided_slice %26 {offsets = [80, 0], sizes = [16, 16], strides = [1, 1]} : vector<96x16xf32> to vector<16x16xf32>
    %cst_25 = arith.constant dense<0.000000e+00> : vector<16x16xf32>
    %56 = tpu.matmul %54, %55, %cst_25 {dimension_numbers = #tpu.dot_dimension_numbers<[1], [0], [0], [1], [0, 0, 1, 1], [], []>} : vector<16x16xf32>, vector<16x16xf32>, vector<16x16xf32> -> vector<16x16xf32>
    %c0_26 = arith.constant 0 : index
    %c0_27 = arith.constant 0 : index
    %57 = vector.load %arg1[%c0_26, %c0_27] : memref<16x32xf32, #tpu.memory_space<vmem>>, vector<16x32xf32>
    %c0_28 = arith.constant 0 : index
    %c0_29 = arith.constant 0 : index
    %58 = vector.load %arg3[%c0_28, %c0_29] : memref<32x16xf32, #tpu.memory_space<vmem>>, vector<32x16xf32>
    %cst_30 = arith.constant dense<0.000000e+00> : vector<16x16xf32>
    %59 = tpu.matmul %57, %58, %cst_30 {dimension_numbers = #tpu.dot_dimension_numbers<[1], [0], [0], [1], [0, 0, 1, 1], [], []>} : vector<16x32xf32>, vector<32x16xf32>, vector<16x16xf32> -> vector<16x16xf32>
    %60 = arith.mulf %44, %6 : vector<16x16xf32>
    %61 = arith.addf %60, %4 : vector<16x16xf32>
    %cst_31 = arith.constant dense<0.000000e+00> : vector<16xf32>
    %62 = vector.multi_reduction <add>, %61, %cst_31 [0] : vector<16x16xf32> to vector<16xf32>
    %63 = vector.shape_cast %62 : vector<16xf32> to vector<1x16xf32>
    %cst_32 = arith.constant 0.000000e+00 : f32
    %64 = vector.broadcast %cst_32 : f32 to vector<1x16xf32>
    %65 = arith.cmpf oeq, %63, %64 : vector<1x16xf32>
    %66 = tpu.reciprocal %63 {approx = true} : vector<1x16xf32> -> vector<1x16xf32>
    %cst_33 = arith.constant 0.000000e+00 : f32
    %67 = vector.broadcast %cst_33 : f32 to vector<1x16xf32>
    %68 = arith.select %65, %67, %66 : vector<1x16xi1>, vector<1x16xf32>
    %69 = vector.broadcast %68 : vector<1x16xf32> to vector<16x16xf32>
    %70 = arith.mulf %61, %69 : vector<16x16xf32>
    %71 = arith.mulf %56, %6 : vector<16x16xf32>
    %72 = arith.addf %71, %4 : vector<16x16xf32>
    %cst_34 = arith.constant dense<0.000000e+00> : vector<16xf32>
    %73 = vector.multi_reduction <add>, %72, %cst_34 [0] : vector<16x16xf32> to vector<16xf32>
    %74 = vector.shape_cast %73 : vector<16xf32> to vector<1x16xf32>
    %cst_35 = arith.constant 0.000000e+00 : f32
    %75 = vector.broadcast %cst_35 : f32 to vector<1x16xf32>
    %76 = arith.cmpf oeq, %74, %75 : vector<1x16xf32>
    %77 = tpu.reciprocal %74 {approx = true} : vector<1x16xf32> -> vector<1x16xf32>
    %cst_36 = arith.constant 0.000000e+00 : f32
    %78 = vector.broadcast %cst_36 : f32 to vector<1x16xf32>
    %79 = arith.select %76, %78, %77 : vector<1x16xi1>, vector<1x16xf32>
    %80 = vector.broadcast %79 : vector<1x16xf32> to vector<16x16xf32>
    %81 = arith.mulf %72, %80 : vector<16x16xf32>
    %82 = tpu.concatenate %70, %81 in 1 : vector<16x16xf32>, vector<16x16xf32> -> vector<16x32xf32>
    %cst_37 = arith.constant dense<0.000000e+00> : vector<32x16xf32>
    %83 = tpu.matmul %82, %59, %cst_37 {dimension_numbers = #tpu.dot_dimension_numbers<[0], [0], [1], [1], [0, 1, 1, 1], [], []>} : vector<16x32xf32>, vector<16x16xf32>, vector<32x16xf32> -> vector<32x16xf32>
    %cst_38 = arith.constant 0.000000e+00 : f32
    %84 = vector.broadcast %cst_38 : f32 to vector<32x16xf32>
    %85 = arith.maximumf %83, %84 : vector<32x16xf32>
    %86 = tpu.iota {dimensions = array<i32: 1>} : vector<4x16xi32>
    %c0_39 = arith.constant 0 : index
    %c0_40 = arith.constant 0 : index
    %87 = vector.load %arg11[%c0_39, %c0_40] : memref<4x1xi32, #tpu.memory_space<vmem>>, vector<4x1xi32>
    %88 = vector.broadcast %87 : vector<4x1xi32> to vector<4x16xi32>
    %89 = arith.cmpi eq, %86, %88 : vector<4x16xi32>
    %90 = arith.extui %89 : vector<4x16xi1> to vector<4x16xi32>
    %91 = arith.sitofp %90 : vector<4x16xi32> to vector<4x16xf32>
    %92 = vector.extract_strided_slice %85 {offsets = [0, 0], sizes = [16, 16], strides = [1, 1]} : vector<32x16xf32> to vector<16x16xf32>
    %cst_41 = arith.constant dense<0.000000e+00> : vector<4x16xf32>
    %93 = tpu.matmul %91, %92, %cst_41 {dimension_numbers = #tpu.dot_dimension_numbers<[1], [0], [0], [1], [0, 0, 1, 1], [], []>} : vector<4x16xf32>, vector<16x16xf32>, vector<4x16xf32> -> vector<4x16xf32>
    %94 = vector.extract_strided_slice %85 {offsets = [16, 0], sizes = [16, 16], strides = [1, 1]} : vector<32x16xf32> to vector<16x16xf32>
    %cst_42 = arith.constant dense<0.000000e+00> : vector<4x16xf32>
    %95 = tpu.matmul %91, %94, %cst_42 {dimension_numbers = #tpu.dot_dimension_numbers<[1], [0], [0], [1], [0, 0, 1, 1], [], []>} : vector<4x16xf32>, vector<16x16xf32>, vector<4x16xf32> -> vector<4x16xf32>
    %96 = tpu.concatenate %93, %95 in 1 : vector<4x16xf32>, vector<4x16xf32> -> vector<4x32xf32>
    %c0_43 = arith.constant 0 : index
    %c0_44 = arith.constant 0 : index
    %97 = vector.load %arg4[%c0_43, %c0_44] : memref<32x16xf32, #tpu.memory_space<vmem>>, vector<32x16xf32>
    %cst_45 = arith.constant dense<0.000000e+00> : vector<4x16xf32>
    %98 = tpu.matmul %96, %97, %cst_45 {dimension_numbers = #tpu.dot_dimension_numbers<[1], [0], [0], [1], [0, 0, 1, 1], [], []>} : vector<4x32xf32>, vector<32x16xf32>, vector<4x16xf32> -> vector<4x16xf32>
    %c0_46 = arith.constant 0 : index
    %c0_47 = arith.constant 0 : index
    %99 = vector.load %arg5[%c0_46, %c0_47] : memref<1x16xf32, #tpu.memory_space<vmem>>, vector<1x16xf32>
    %100 = vector.broadcast %99 : vector<1x16xf32> to vector<4x16xf32>
    %101 = arith.addf %98, %100 : vector<4x16xf32>
    %cst_48 = arith.constant 0.000000e+00 : f32
    %102 = vector.broadcast %cst_48 : f32 to vector<4x16xf32>
    %103 = arith.maximumf %101, %102 : vector<4x16xf32>
    %c0_49 = arith.constant 0 : index
    %c0_50 = arith.constant 0 : index
    %104 = vector.load %arg6[%c0_49, %c0_50] : memref<16x4xf32, #tpu.memory_space<vmem>>, vector<16x4xf32>
    %cst_51 = arith.constant dense<0.000000e+00> : vector<4x4xf32>
    %105 = tpu.matmul %103, %104, %cst_51 {dimension_numbers = #tpu.dot_dimension_numbers<[1], [0], [0], [1], [0, 0, 1, 1], [], []>} : vector<4x16xf32>, vector<16x4xf32>, vector<4x4xf32> -> vector<4x4xf32>
    %c0_52 = arith.constant 0 : index
    %c0_53 = arith.constant 0 : index
    %106 = vector.load %arg7[%c0_52, %c0_53] : memref<1x4xf32, #tpu.memory_space<vmem>>, vector<1x4xf32>
    %107 = vector.broadcast %106 : vector<1x4xf32> to vector<4x4xf32>
    %108 = arith.addf %105, %107 : vector<4x4xf32>
    %cst_54 = arith.constant dense<0xFF800000> : vector<4xf32>
    %109 = vector.multi_reduction <maximumf>, %108, %cst_54 [1] : vector<4x4xf32> to vector<4xf32>
    %110 = vector.shape_cast %109 : vector<4xf32> to vector<4x1xf32>
    %111 = vector.broadcast %110 : vector<4x1xf32> to vector<4x4xf32>
    %112 = arith.subf %108, %111 : vector<4x4xf32>
    %113 = math.exp %112 : vector<4x4xf32>
    %cst_55 = arith.constant dense<0.000000e+00> : vector<4xf32>
    %114 = vector.multi_reduction <add>, %113, %cst_55 [1] : vector<4x4xf32> to vector<4xf32>
    %115 = vector.shape_cast %114 : vector<4xf32> to vector<4x1xf32>
    %116 = math.log %115 : vector<4x1xf32>
    %117 = arith.addf %116, %110 : vector<4x1xf32>
    %118 = tpu.iota {dimensions = array<i32: 1>} : vector<4x4xi32>
    %c0_56 = arith.constant 0 : index
    %c0_57 = arith.constant 0 : index
    %119 = vector.load %arg12[%c0_56, %c0_57] : memref<4x1xi32, #tpu.memory_space<vmem>>, vector<4x1xi32>
    %120 = vector.broadcast %119 : vector<4x1xi32> to vector<4x4xi32>
    %121 = arith.cmpi eq, %118, %120 : vector<4x4xi32>
    %122 = arith.extui %121 : vector<4x4xi1> to vector<4x4xi32>
    %123 = arith.sitofp %122 : vector<4x4xi32> to vector<4x4xf32>
    %124 = arith.mulf %123, %108 : vector<4x4xf32>
    %cst_58 = arith.constant dense<0.000000e+00> : vector<4xf32>
    %125 = vector.multi_reduction <add>, %124, %cst_58 [1] : vector<4x4xf32> to vector<4xf32>
    %126 = vector.shape_cast %125 : vector<4xf32> to vector<4x1xf32>
    %127 = arith.subf %117, %126 : vector<4x1xf32>
    %cst_59 = arith.constant dense<0.000000e+00> : vector<1xf32>
    %128 = vector.multi_reduction <add>, %127, %cst_59 [0] : vector<4x1xf32> to vector<1xf32>
    %129 = vector.shape_cast %128 : vector<1xf32> to vector<1x1xf32>
    %cst_60 = arith.constant 2.500000e-01 : f32
    %130 = vector.broadcast %cst_60 : f32 to vector<1x1xf32>
    %131 = arith.mulf %129, %130 : vector<1x1xf32>
    %132 = vector.shape_cast %131 : vector<1x1xf32> to vector<1x1xf32>
    %133 = vector.broadcast %132 : vector<1x1xf32> to vector<1x4xf32>
    %134 = tpu.concatenate %108, %133 in 0 : vector<4x4xf32>, vector<1x4xf32> -> vector<5x4xf32>
    %c0_61 = arith.constant 0 : index
    %c0_62 = arith.constant 0 : index
    %135 = vector.load %arg13[%c0_61, %c0_62] : memref<5x4xf32, #tpu.memory_space<vmem>>, vector<5x4xf32>
    tpu.vector_store %arg13[%c0_61, %c0_62], %134 {strides = array<i32>} : memref<5x4xf32, #tpu.memory_space<vmem>>, vector<5x4xf32>,
    return
  }
}

</mosaic_0001>

<bundles_post_ra>
// kernel: gtn_forward.1
= control target key start
LH: loop header
LB: loop body
LE: loop exit
PB: predicated region body
PF: predicated region fallthrough
CT: control target
= control target key end

     0   :  { %vm60_vm0 = vcmask 37888   ;;  %vm122_vm1 = vcmask 1045504   ;;  %vm85_vm2 = vcmask 48128   ;;  %vm217_vm3 = vcmask 1044480   ;;  %s951_s29 = smov 16   ;;  %s1287_s2 = inlined_call_operand.vmem [shape: f32[6,5], index: 2, kind: input, shape index: {}]   ;;  %s1288_s8 = inlined_call_operand.vmem [shape: f32[96,6], index: 8, kind: input, shape index: {}]   ;;  %s1289_s14 = inlined_call_operand.vmem [shape: f32[6,5], index: 14, kind: output, shape index: {1}]   ;;  %s1290_s9 = inlined_call_operand.vmem [shape: f32[5,80], index: 9, kind: input, shape index: {}]   ;;  %s1291_s0 = inlined_call_operand.vmem [shape: f32[80,16], index: 0, kind: input, shape index: {}]   ;;  %s1292_s10 = inlined_call_operand.vmem [shape: f32[96,80], index: 10, kind: input, shape index: {}]   ;;  %s1293_s3 = inlined_call_operand.vmem [shape: f32[32,16], index: 3, kind: input, shape index: {}]   ;;  %s1294_s1 = inlined_call_operand.vmem [shape: f32[16,32], index: 1, kind: input, shape index: {}]   ;;  %s1295_s11 = inlined_call_operand.vmem [shape: s32[4,1], index: 11, kind: input, shape index: {}]   ;;  %s1296_s4 = inlined_call_operand.vmem [shape: f32[32,16], index: 4, kind: input, shape index: {}]   ;;  %s1297_s5 = inlined_call_operand.vmem [shape: f32[1,16], index: 5, kind: input, shape index: {}]   ;;  %s1298_s7 = inlined_call_operand.vmem [shape: f32[1,4], index: 7, kind: input, shape index: {}]   ;;  %s1299_s6 = inlined_call_operand.vmem [shape: f32[16,4], index: 6, kind: input, shape index: {}]   ;;  %s1300_s12 = inlined_call_operand.vmem [shape: s32[4,1], index: 12, kind: input, shape index: {}]   ;;  %s1301_s13 = inlined_call_operand.vmem [shape: f32[5,4], index: 13, kind: output, shape index: {0}]  }
   0x1   :  { %v59_v0 = vld [vmem:[%s1287_s2] sm:$0x3f]  ;;  %v74_v11 = vld [vmem:[%s1288_s8 + $0x8] sm:$0xff]  ;;  %v75_v12 = vld [vmem:[%s1288_s8 + $0x10] sm:$0xff]  ;;  %vm180_vm4 = vcmask 39936   ;;  %vm308_vm5 = vcmask 654336  }
   0x2   :  { %v61_v1 = vsel %vm60_vm0, %v59_v0, -inf  ;;  %v73_v10 = vld [vmem:[%s1288_s8] sm:$0xff]  ;;  %v76_v13 = vld [vmem:[%s1288_s8 + $0x18] sm:$0xff]  ;;  %v78_v15 = vld [vmem:[%s1288_s8 + $0x28] sm:$0xff]  ;;  %vm398_vm6 = vcmask 130048   ;;  %vm553_vm13 = vcmask 261120  }
   0x3   :  { %62 = vmax.xlane.f32.xlu0 %v61_v1  ;;  %v77_v14 = vld [vmem:[%s1288_s8 + $0x20] sm:$0xff]  ;;  %v79_v16 = vld [vmem:[%s1288_s8 + $0x30] sm:$0xff]  ;;  %v80_v17 = vld [vmem:[%s1288_s8 + $0x38] sm:$0xff] }
   0x4   :  { %v179_v18 = vld [vmem:[%s1290_s9] sm:$0x1f]  ;;  %v307_v24 = vld [vmem:[%s1291_s0 + $0x48] sm:$0xff]  ;;  %v305_v26 = vld [vmem:[%s1291_s0 + $0x38] sm:$0xff] }
   0x5   :  { %882 = vmatpush.msk.msra.mxu1 %vm217_vm3, %v179_v18  ;;  %v81_v23 = vld [vmem:[%s1288_s8 + $0x40] sm:$0xff]  ;;  %351 = vmatpush.msra.mxu2 %v307_v24  ;;  %v304_v27 = vld [vmem:[%s1291_s0 + $0x30] sm:$0xff]  ;;  %v82_v28 = vld [vmem:[%s1288_s8 + $0x48] sm:$0xff] }
   0x6   :  { %v306_v25 = vld [vmem:[%s1291_s0 + $0x40] sm:$0xff]  ;;  %v303_v30 = vld [vmem:[%s1291_s0 + $0x28] sm:$0xff]  ;;  %v301_v32 = vld [vmem:[%s1291_s0 + $0x18] sm:$0xff] }
   0x7   :  { %352 = vmatpush.msra.mxu2 %v306_v25  ;;  %v302_v31 = vld [vmem:[%s1291_s0 + $0x20] sm:$0xff]  ;;  %v300_v33 = vld [vmem:[%s1291_s0 + $0x10] sm:$0xff]  ;;  %v84_v36 = vld [vmem:[%s1288_s8 + $0x58] sm:$0xff] }
   0x8   :  { %v83_v34 = vld [vmem:[%s1288_s8 + $0x50] sm:$0xff]  ;;  %v299_v39 = vld [vmem:[%s1291_s0 + $0x8] sm:$0xff]  ;;  %v298_v40 = vld [vmem:[%s1291_s0] sm:$0xff] }
   0x9   :  { %353 = vmatpush.msra.mxu2 %v305_v26  ;;  %v274_v41 = vld [vmem:[%s1292_s10] sm:$0xff]  ;;  %v275_v44 = vld [vmem:[%s1292_s10 + $0x8] sm:$0xff]  ;;  %v276_v47 = vld [vmem:[%s1292_s10 + $0x10] sm:$0xff]  ;;  %v46_v26 = vlaneseq }
   0xa   :  { %v277_v50 = vld [vmem:[%s1292_s10 + $0x18] sm:$0xff]  ;;  %v278_v54 = vld [vmem:[%s1292_s10 + $0x20] sm:$0xff]  ;;  %v279_v58 = vld [vmem:[%s1292_s10 + $0x28] sm:$0xff] }
   0xb   :  { %354 = vmatpush.msra.mxu2 %v304_v27  ;;  %v280_v62 = vld [vmem:[%s1292_s10 + $0x30] sm:$0xff] }
   0xd   :  { %355 = vmatpush.msra.mxu2 %v303_v30 }
   0xf   :  { %356 = vmatpush.msra.mxu2 %v302_v31 }
  0x11   :  { %357 = vmatpush.msra.mxu2 %v301_v32  ;;  %v950_v32 = vmov 0.0  }
  0x13   :  { %358 = vmatpush.msra.mxu2 %v300_v33 }
  0x15   :  { %359 = vmatpush.msra.mxu2 %v299_v39 }
  0x17   :  { %360 = vmatpush.msra.mxu2 %v298_v40 }
  0x76   :  { %v63_v2 = vpop.xlane.xlu0 %62 }
  0x77   :  { %v64_v3 = vsub.f32 %v59_v0, %v63_v2  ;;  %v281_v2 = vld [vmem:[%s1292_s10 + $0x38] sm:$0xff] }
  0x79   :  { %v65_v4 = vmul.f32 1.442695, %v64_v3 }
  0x7b   :  { %934 = vpow2.f32 %v65_v4 }
  0x81   :  { %v935_v5 = vpop.eup %934 }
  0x82   :  { %v67_v6 = vsel %vm60_vm0, %v935_v5, 0.0 }
  0x83   :  { %68 = vadd.xlane.f32.xlu0 %v67_v6 }
  0xf6   :  { %v69_v7 = vpop.xlane.xlu0 %68 }
  0xf7   :  { %936 = vrcp.f32 %v69_v7 }
  0xfd   :  { %v937_v8 = vpop.eup %936 }
  0xfe   :  { %v71_v9 = vmul.f32 %v937_v8, %v935_v5 }
 0x100   :  { %72 = vst.msk [vmem:[%s1289_s14] sm:$0x3f] %vm60_vm0, %v71_v9  ;;  %869 = vmatpush.msk.msra.mxu0 %vm122_vm1, %v71_v9  ;;  %v282_v9 = vld [vmem:[%s1292_s10 + $0x40] sm:$0xff]  ;;  %vm822_vm0 = vcmask 27648   ;;  %vm847_vm1 = vcmask 1043456  }
 0x101   :  { %870 = vmatmul.msk.f32.vlgmr.msra.gmra.mxu0 %vm85_vm2, %v73_v10 }
 0x109   :  { %871 = vmatmul.msk.f32.gmra.mxu0 %vm85_vm2, %v74_v11 }
 0x111   :  { %872 = vmatmul.msk.f32.gmra.mxu0 %vm85_vm2, %v75_v12 }
 0x119   :  { %873 = vmatmul.msk.f32.gmra.mxu0 %vm85_vm2, %v76_v13  ;;  %v283_v13 = vld [vmem:[%s1292_s10 + $0x48] sm:$0xff] }
 0x121   :  { %874 = vmatmul.msk.f32.gmra.mxu0 %vm85_vm2, %v77_v14 }
 0x129   :  { %875 = vmatmul.msk.f32.gmra.mxu0 %vm85_vm2, %v78_v15 }
 0x131   :  { %876 = vmatmul.msk.f32.gmra.mxu0 %vm85_vm2, %v79_v16 }
 0x139   :  { %877 = vmatmul.msk.f32.gmra.mxu0 %vm85_vm2, %v80_v17  ;;  %v284_v17 = vld [vmem:[%s1292_s10 + $0x50] sm:$0xff] }
 0x141   :  { %878 = vmatmul.msk.f32.gmra.mxu0 %vm85_vm2, %v81_v23 }
 0x149   :  { %879 = vmatmul.msk.f32.gmra.mxu0 %vm85_vm2, %v82_v28  ;;  %v47_v28 = vshrl.u32 %v46_v26, 7 }
 0x14b   :  { %v48_v30 = vadd.s32 8, %v47_v28 }
 0x151   :  { %880 = vmatmul.msk.f32.gmra.mxu0 %vm85_vm2, %v83_v34 }
 0x159   :  { %881 = vmatmul.msk.f32.gmra.mxu0 %vm85_vm2, %v84_v36  ;;  %vm857_vm2 = vcmask 28672  }
 0x17e   :  { %v143_v19 = vpop.f32.mrf.mxu0 }
 0x17f   :  { %883 = vmatmul.msk.f32.vlgmr.msra.gmra.mxu1 %vm180_vm4, %v143_v19 }
 0x186   :  { %v146_v20 = vpop.f32.mrf.mxu0 }
 0x187   :  { %884 = vmatmul.msk.f32.gmra.mxu1 %vm180_vm4, %v146_v20  ;;  %v285_v20 = vld [vmem:[%s1292_s10 + $0x58] sm:$0xff] }
 0x18e   :  { %v149_v21 = vpop.f32.mrf.mxu0 }
 0x18f   :  { %885 = vmatmul.msk.f32.gmra.mxu1 %vm180_vm4, %v149_v21 }
 0x196   :  { %v152_v22 = vpop.f32.mrf.mxu0 }
 0x197   :  { %886 = vmatmul.msk.f32.gmra.mxu1 %vm180_vm4, %v152_v22 }
 0x19e   :  { %v155_v29 = vpop.f32.mrf.mxu0 }
 0x19f   :  { %887 = vmatmul.msk.f32.gmra.mxu1 %vm180_vm4, %v155_v29  ;;  %v1182_v29 = vand.u32 127, %v46_v26 }
 0x1a1   :  { %vm51_vm7 = vcmp.eq.s32.totalorder %v47_v28, %v1182_v29  ;;  %vm52_vm8 = vcmp.eq.s32.totalorder %v48_v30, %v1182_v29 }
 0x1a2   :  { %v1187_v33 = vsel %vm51_vm7, 1.0, %v950_v32 }
 0x1a3   :  { %v57_v36 = vsub.f32 1.0, %v1187_v33 }
 0x1a6   :  { %v158_v35 = vpop.f32.mrf.mxu0 }
 0x1a7   :  { %888 = vmatmul.msk.f32.gmra.mxu1 %vm180_vm4, %v158_v35  ;;  %v1190_v35 = vsel %vm52_vm8, 1.0, %v950_v32 }
 0x1ae   :  { %v161_v37 = vpop.f32.mrf.mxu0 }
 0x1af   :  { %889 = vmatmul.msk.f32.gmra.mxu1 %vm180_vm4, %v161_v37  ;;  %v1194_v37 = vsub.f32 1.0, %v1190_v35 }
 0x1b6   :  { %v164_v38 = vpop.f32.mrf.mxu0 }
 0x1b7   :  { %890 = vmatmul.msk.f32.gmra.mxu1 %vm180_vm4, %v164_v38 }
 0x1be   :  { %v167_v53 = vpop.f32.mrf.mxu0 }
 0x1bf   :  { %891 = vmatmul.msk.f32.gmra.mxu1 %vm180_vm4, %v167_v53 }
 0x1c6   :  { %v170_v57 = vpop.f32.mrf.mxu0 }
 0x1c7   :  { %892 = vmatmul.msk.f32.gmra.mxu1 %vm180_vm4, %v170_v57 }
 0x1ce   :  { %v173_v61 = vpop.f32.mrf.mxu0 }
 0x1cf   :  { %893 = vmatmul.msk.f32.gmra.mxu1 %vm180_vm4, %v173_v61 }
 0x1d6   :  { %v176_v1 = vpop.f32.mrf.mxu0 }
 0x1d7   :  { %894 = vmatmul.msk.f32.gmra.mxu1 %vm180_vm4, %v176_v1 }
 0x1fc   :  { %v238_v42 = vpop.f32.mrf.mxu1 }
 0x1fd   :  { %v286_v43 = vmul.f32 %v274_v41, %v238_v42 }
 0x1ff   :  { %895 = vmatmul.msk.f32.vlgmr.msra.gmra.mxu2 %vm308_vm5, %v286_v43 }
 0x204   :  { %v241_v45 = vpop.f32.mrf.mxu1 }
 0x205   :  { %v287_v46 = vmul.f32 %v275_v44, %v241_v45 }
 0x207   :  { %896 = vmatmul.msk.f32.gmra.mxu2 %vm308_vm5, %v287_v46 }
 0x20c   :  { %v244_v48 = vpop.f32.mrf.mxu1 }
 0x20d   :  { %v288_v49 = vmul.f32 %v276_v47, %v244_v48 }
 0x20f   :  { %897 = vmatmul.msk.f32.gmra.mxu2 %vm308_vm5, %v288_v49 }
 0x214   :  { %v247_v51 = vpop.f32.mrf.mxu1 }
 0x215   :  { %v289_v52 = vmul.f32 %v277_v50, %v247_v51 }
 0x217   :  { %898 = vmatmul.msk.f32.gmra.mxu2 %vm308_vm5, %v289_v52 }
 0x21c   :  { %v250_v55 = vpop.f32.mrf.mxu1 }
 0x21d   :  { %v290_v56 = vmul.f32 %v278_v54, %v250_v55 }
 0x21f   :  { %899 = vmatmul.msk.f32.gmra.mxu2 %vm308_vm5, %v290_v56 }
 0x224   :  { %v253_v59 = vpop.f32.mrf.mxu1 }
 0x225   :  { %v291_v60 = vmul.f32 %v279_v58, %v253_v59 }
 0x227   :  { %900 = vmatmul.msk.f32.gmra.mxu2 %vm308_vm5, %v291_v60 }
 0x22c   :  { %v256_v63 = vpop.f32.mrf.mxu1 }
 0x22d   :  { %v292_v0 = vmul.f32 %v280_v62, %v256_v63 }
 0x22f   :  { %901 = vmatmul.msk.f32.gmra.mxu2 %vm308_vm5, %v292_v0 }
 0x234   :  { %v259_v3 = vpop.f32.mrf.mxu1 }
 0x235   :  { %v293_v4 = vmul.f32 %v281_v2, %v259_v3 }
 0x237   :  { %902 = vmatmul.msk.f32.gmra.mxu2 %vm308_vm5, %v293_v4 }
 0x23c   :  { %v262_v8 = vpop.f32.mrf.mxu1 }
 0x23d   :  { %v294_v10 = vmul.f32 %v282_v9, %v262_v8 }
 0x23f   :  { %903 = vmatmul.msk.f32.gmra.mxu2 %vm308_vm5, %v294_v10 }
 0x244   :  { %v265_v12 = vpop.f32.mrf.mxu1 }
 0x245   :  { %v295_v14 = vmul.f32 %v283_v13, %v265_v12 }
 0x247   :  { %904 = vmatmul.msk.f32.gmra.mxu2 %vm308_vm5, %v295_v14 }
 0x24c   :  { %v268_v16 = vpop.f32.mrf.mxu1 }
 0x24d   :  { %v296_v18 = vmul.f32 %v284_v17, %v268_v16 }
 0x24f   :  { %905 = vmatmul.msk.f32.gmra.mxu2 %vm308_vm5, %v296_v18 }
 0x254   :  { %v271_v21 = vpop.f32.mrf.mxu1 }
 0x255   :  { %v297_v22 = vmul.f32 %v285_v20, %v271_v21 }
 0x257   :  { %906 = vmatmul.msk.f32.gmra.mxu2 %vm308_vm5, %v297_v22 }
 0x282   :  { %v362_v5 = vpop.f32.mrf.mxu2 }
 0x28a   :  { %v365_v6 = vpop.f32.mrf.mxu2 }
 0x292   :  { %v368_v7 = vpop.f32.mrf.mxu2 }
 0x29a   :  { %v371_v11 = vpop.f32.mrf.mxu2 }
 0x2a2   :  { %v374_v15 = vpop.f32.mrf.mxu2 }
 0x2aa   :  { %v377_v19 = vpop.f32.mrf.mxu2 }
 0x2ab   :  { %419 = vmatpush.msra.mxu3 %v377_v19 }
 0x2ad   :  { %420 = vmatpush.msra.mxu3 %v374_v15 }
 0x2ae   :  { %907 = vmatmul.msk.f32.vlgmr.msra.gmra.mxu3 %vm398_vm6, %v362_v5 }
 0x2b2   :  { %v380_v23 = vpop.f32.mrf.mxu2 }
 0x2b6   :  { %908 = vmatmul.msk.f32.gmra.mxu3 %vm398_vm6, %v365_v6 }
 0x2ba   :  { %v383_v24 = vpop.f32.mrf.mxu2 }
 0x2bb   :  { %448 = vmatpush.msrb.mxu3 %v383_v24 }
 0x2bd   :  { %449 = vmatpush.msrb.mxu3 %v380_v23 }
 0x2be   :  { %909 = vmatmul.msk.f32.vlgmr.msrb.gmra.mxu3 %vm398_vm6, %v368_v7 }
 0x2c2   :  { %v386_v25 = vpop.f32.mrf.mxu2 }
 0x2c6   :  { %910 = vmatmul.msk.f32.gmra.mxu3 %vm398_vm6, %v371_v11 }
 0x2ca   :  { %v389_v27 = vpop.f32.mrf.mxu2 }
 0x2cb   :  { %493 = vmatpush.msra.mxu3 %v389_v27 }
 0x2cd   :  { %494 = vmatpush.msra.mxu3 %v386_v25 }
 0x2d2   :  { %v392_v31 = vpop.f32.mrf.mxu2 }
 0x2da   :  { %v395_v38 = vpop.f32.mrf.mxu2 }
 0x2db   :  { %538 = vmatpush.msrb.mxu3 %v395_v38  ;;  %v551_v38 = vld [vmem:[%s1293_s3 + $0x10] sm:$0xff] }
 0x2dd   :  { %539 = vmatpush.msrb.mxu3 %v392_v31 }
 0x331   :  { %v422_v34 = vpop.f32.mrf.mxu3 }
 0x332   :  { %v457_v39 = vmul.f32 %v422_v34, %v57_v36 }
 0x334   :  { %v459_v42 = vsel %vm398_vm6, %v457_v39, 0.0 }
 0x339   :  { %v425_v40 = vpop.f32.mrf.mxu3 }
 0x33a   :  { %v458_v41 = vmul.f32 %v425_v40, %v1194_v37 }
 0x33c   :  { %v460_v43 = vsel %vm398_vm6, %v458_v41, 0.0 }
 0x33d   :  { %v461_v44 = vadd.f32 %v460_v43, %v459_v42 }
 0x33f   :  { %v462_v45 = vrot.slane %v461_v44, 4 }
 0x341   :  { %v463_v46 = vadd.f32 %v462_v45, %v461_v44  ;;  %v451_v47 = vpop.f32.mrf.mxu3 }
 0x342   :  { %v502_v51 = vmul.f32 %v451_v47, %v57_v36 }
 0x343   :  { %v464_v48 = vrot.slane %v463_v46, 2 }
 0x344   :  { %v504_v55 = vsel %vm398_vm6, %v502_v51, 0.0 }
 0x345   :  { %v465_v49 = vadd.f32 %v464_v48, %v463_v46 }
 0x347   :  { %v466_v50 = vrot.slane %v465_v49, 1 }
 0x349   :  { %v467_v52 = vadd.f32 %v466_v50, %v465_v49  ;;  %v454_v53 = vpop.f32.mrf.mxu3 }
 0x34a   :  { %v503_v54 = vmul.f32 %v454_v53, %v1194_v37  ;;  %v548_v53 = vld [vmem:[%s1294_s1 + $0x8] sm:$0xff] }
 0x34b   :  { %938 = vrcp.f32 %v467_v52  ;;  %vm468_vm9 = vcmp.eq.f32.partialorder %v467_v52, 0.0  ;;  %v547_v52 = vld [vmem:[%s1294_s1] sm:$0xff] }
 0x34c   :  { %v505_v56 = vsel %vm398_vm6, %v503_v54, 0.0 }
 0x34d   :  { %v506_v57 = vadd.f32 %v505_v56, %v504_v55 }
 0x34f   :  { %v507_v58 = vrot.slane %v506_v57, 4 }
 0x351   :  { %v939_v59 = vpop.eup %938  ;;  %v508_v60 = vadd.f32 %v507_v58, %v506_v57 }
 0x352   :  { %v470_v61 = vsel %vm468_vm9, 0.0, %v939_v59 }
 0x353   :  { %v471_v62 = vmul.f32 %v470_v61, %v457_v39  ;;  %v509_v63 = vrot.slane %v508_v60, 2  ;;  %v472_v3 = vmul.f32 %v470_v61, %v458_v41  ;;  %v952_v61 = vmov 0  }
 0x354   :  { %930 = vset.pattern.permute.xlu0 %v952_v61  ;;  %931 = vset.pattern.permute.xlu1 %v952_v61 }
 0x355   :  { %v510_v0 = vadd.f32 %v509_v63, %v508_v60  ;;  %911 = vmatmul.msk.f32.vlgmr.msra.gmra.mxu3 %vm398_vm6, %v471_v62  ;;  %v706_v60 = vld [vmem:[%s1295_s11] sm:$0xf] }
 0x356   :  { %708 = vperm.xlu0 %930, %v706_v60  }
 0x357   :  { %v511_v1 = vrot.slane %v510_v0, 1 }
 0x359   :  { %v512_v2 = vadd.f32 %v511_v1, %v510_v0 }
 0x35b   :  { %940 = vrcp.f32 %v512_v2  ;;  %vm513_vm10 = vcmp.eq.f32.partialorder %v512_v2, 0.0 }
 0x35d   :  { %912 = vmatmul.msk.f32.gmra.mxu3 %vm398_vm6, %v472_v3 }
 0x361   :  { %v941_v4 = vpop.eup %940 }
 0x362   :  { %v515_v5 = vsel %vm513_vm10, 0.0, %v941_v4 }
 0x363   :  { %v516_v6 = vmul.f32 %v515_v5, %v502_v51  ;;  %v517_v7 = vmul.f32 %v515_v5, %v503_v54  ;;  %v549_v51 = vld [vmem:[%s1293_s3] sm:$0xff] }
 0x365   :  { %913 = vmatmul.msk.f32.vlgmr.msrb.gmra.mxu3 %vm398_vm6, %v516_v6 }
 0x36d   :  { %914 = vmatmul.msk.f32.gmra.mxu3 %vm398_vm6, %v517_v7 }
 0x3c8   :  { %v709_v3 = vpop.permute.xlu0 %708 }
 0x3c9   :  { %vm710_vm14 = vcmp.eq.s32.totalorder %v1182_v29, %v709_v3 }
 0x3ca   :  { %v921_v7 = vsel %vm710_vm14, 1.0, %v950_v32 }
 0x3d8   :  { %v496_v8 = vpop.f32.mrf.mxu3 }
 0x3d9   :  { %v583_v9 = vmul.f32 %v496_v8, %v57_v36 }
 0x3db   :  { %v585_v11 = vadd.f32 %v1187_v33, %v583_v9 }
 0x3dd   :  { %v587_v14 = vsel %vm398_vm6, %v585_v11, 0.0 }
 0x3e0   :  { %v499_v10 = vpop.f32.mrf.mxu3 }
 0x3e1   :  { %v584_v12 = vmul.f32 %v499_v10, %v1194_v37 }
 0x3e3   :  { %v586_v13 = vadd.f32 %v1190_v35, %v584_v12  ;;  %v764_v12 = vld [vmem:[%s1296_s4 + $0x18] sm:$0xff] }
 0x3e5   :  { %v588_v15 = vsel %vm398_vm6, %v586_v13, 0.0 }
 0x3e6   :  { %v589_v16 = vadd.f32 %v588_v15, %v587_v14  ;;  %v762_v14 = vld [vmem:[%s1296_s4 + $0x8] sm:$0xff] }
 0x3e8   :  { %v590_v17 = vrot.slane %v589_v16, 4  ;;  %v541_v18 = vpop.f32.mrf.mxu3 }
 0x3e9   :  { %v601_v21 = vmul.f32 %v541_v18, %v57_v36  ;;  %v552_v36 = vld [vmem:[%s1293_s3 + $0x18] sm:$0xff] }
 0x3ea   :  { %v591_v19 = vadd.f32 %v590_v17, %v589_v16  ;;  %572 = vmatpush.msra.mxu3 %v552_v36  ;;  %v761_v16 = vld [vmem:[%s1296_s4] sm:$0xff] }
 0x3eb   :  { %v603_v25 = vadd.f32 %v1187_v33, %v601_v21  ;;  %v793_v21 = vld [vmem:[%s1299_s6] sm:$0xff] }
 0x3ec   :  { %v592_v20 = vrot.slane %v591_v19, 2  ;;  %573 = vmatpush.msra.mxu3 %v551_v38 }
 0x3ed   :  { %v605_v30 = vsel %vm398_vm6, %v603_v25, 0.0 }
 0x3ee   :  { %v593_v22 = vadd.f32 %v592_v20, %v591_v19  ;;  %v794_v20 = vld [vmem:[%s1299_s6 + $0x8] sm:$0xff] }
 0x3f0   :  { %v594_v23 = vrot.slane %v593_v22, 1  ;;  %v544_v24 = vpop.f32.mrf.mxu3 }
 0x3f1   :  { %v602_v26 = vmul.f32 %v544_v24, %v1194_v37 }
 0x3f2   :  { %v595_v27 = vadd.f32 %v594_v23, %v593_v22  ;;  %v835_v22 = vld [vmem:[%s1300_s12] sm:$0xf] }
 0x3f3   :  { %v604_v28 = vadd.f32 %v1190_v35, %v602_v26  ;;  %v550_v35 = vld [vmem:[%s1293_s3 + $0x8] sm:$0xff]  ;;  %v932_v23 = vld [vmem:[%s1297_s5] ss:$0 sm:$0xff] }
 0x3f4   :  { %942 = vrcp.f32 %v595_v27  ;;  %vm596_vm11 = vcmp.eq.f32.partialorder %v595_v27, 0.0  ;;  %574 = vmatpush.msra.mxu3 %v550_v35 }
 0x3f5   :  { %v606_v31 = vsel %vm398_vm6, %v604_v28, 0.0 }
 0x3f6   :  { %v607_v34 = vadd.f32 %v606_v31, %v605_v30  ;;  %575 = vmatpush.msra.mxu3 %v549_v51 }
 0x3f7   :  { %915 = vmatmul.msk.f32.vlgmr.msra.gmra.mxu3 %vm553_vm13, %v547_v52 }
 0x3f8   :  { %v608_v33 = vrot.slane %v607_v34, 4 }
 0x3fa   :  { %v943_v37 = vpop.eup %942  ;;  %v609_v39 = vadd.f32 %v608_v33, %v607_v34 }
 0x3fb   :  { %v598_v40 = vsel %vm596_vm11, 0.0, %v943_v37 }
 0x3fc   :  { %v600_v41 = vmul.f32 %v598_v40, %v586_v13  ;;  %v610_v42 = vrot.slane %v609_v39, 2  ;;  %v599_v43 = vmul.f32 %v598_v40, %v585_v11  ;;  %v763_v13 = vld [vmem:[%s1296_s4 + $0x10] sm:$0xff] }
 0x3fe   :  { %v611_v44 = vadd.f32 %v610_v42, %v609_v39 }
 0x3ff   :  { %916 = vmatmul.msk.f32.gmra.mxu3 %vm553_vm13, %v548_v53 }
 0x400   :  { %v612_v45 = vrot.slane %v611_v44, 1 }
 0x402   :  { %v613_v46 = vadd.f32 %v612_v45, %v611_v44 }
 0x404   :  { %944 = vrcp.f32 %v613_v46  ;;  %vm614_vm12 = vcmp.eq.f32.partialorder %v613_v46, 0.0 }
 0x40a   :  { %v945_v47 = vpop.eup %944 }
 0x40b   :  { %v616_v48 = vsel %vm614_vm12, 0.0, %v945_v47 }
 0x40c   :  { %v617_v49 = vmul.f32 %v616_v48, %v603_v25  ;;  %v618_v50 = vmul.f32 %v616_v48, %v604_v28  ;;  %v933_v28 = vld [vmem:[%s1298_s7] ss:$0 sm:$0xff] }
 0x40e   :  { %621 = vrot.lane.b32.xlu1 %v617_v49, %s951_s29 }
 0x416   :  { %623 = vrot.lane.b32.xlu1 %v618_v50, %s951_s29 }
 0x47a   :  { %v577_v58 = vpop.f32.mrf.mxu3 }
 0x480   :  { %v622_v54 = vpop.permute.xlu1 %621 }
 0x481   :  { %v627_v55 = vsel %vm398_vm6, %v599_v43, %v622_v54 }
 0x482   :  { %629 = vxpose.xlu2.b32.start [1/2] (short) (narrow) %v627_v55, 32  ;;  %v580_v59 = vpop.f32.mrf.mxu3 }
 0x483   :  { %687 = vmatpush.msrb.mxu3 %v580_v59 }
 0x485   :  { %688 = vmatpush.msrb.mxu3 %v577_v58 }
 0x488   :  { %v624_v56 = vpop.permute.xlu1 %623 }
 0x489   :  { %v628_v57 = vsel %vm398_vm6, %v600_v41, %v624_v56 }
 0x48a   :  { %630 = vxpose.xlu2.b32.end [2/2] (short) (narrow) %v628_v57, 32 }
 0x51b   :  { %v645_v62 = vpop.trf.xlu2 }
 0x51c   :  { %917 = vmatmul.msk.f32.vlgmr.msrb.gmra.mxu3 %vm398_vm6, %v645_v62 }
 0x523   :  { %v646_v63 = vpop.trf.xlu2 }
 0x524   :  { %918 = vmatmul.msk.f32.gmra.mxu3 %vm398_vm6, %v646_v63 }
 0x52b   :  { %v647_v0 = vpop.trf.xlu2 }
 0x52c   :  { %919 = vmatmul.msk.f32.gmra.mxu3 %vm398_vm6, %v647_v0 }
 0x533   :  { %v648_v1 = vpop.trf.xlu2 }
 0x534   :  { %920 = vmatmul.msk.f32.gmra.mxu3 %vm398_vm6, %v648_v1 }
 0x59f   :  { %v690_v2 = vpop.f32.mrf.mxu3 }
 0x5a0   :  { %v702_v6 = vmax.f32 %v690_v2, 0.0 }
 0x5a7   :  { %v693_v4 = vpop.f32.mrf.mxu3 }
 0x5a8   :  { %v703_v5 = vmax.f32 %v693_v4, 0.0 }
 0x5aa   :  { %730 = vmatpush.msrb.mxu0 %v703_v5 }
 0x5ac   :  { %731 = vmatpush.msrb.mxu0 %v702_v6 }
 0x5ad   :  { %922 = vmatmul.msk.f32.vlgmr.msrb.gmra.mxu0 %vm398_vm6, %v921_v7 }
 0x5ae   :  { %784 = vmatpush.msra.mxu0 %v764_v12 }
 0x5af   :  { %v696_v8 = vpop.f32.mrf.mxu3 }
 0x5b0   :  { %v704_v11 = vmax.f32 %v696_v8, 0.0  ;;  %785 = vmatpush.msra.mxu0 %v763_v13 }
 0x5b2   :  { %786 = vmatpush.msra.mxu0 %v762_v14 }
 0x5b4   :  { %787 = vmatpush.msra.mxu0 %v761_v16 }
 0x5b7   :  { %v699_v9 = vpop.f32.mrf.mxu3 }
 0x5b8   :  { %v705_v10 = vmax.f32 %v699_v9, 0.0 }
 0x5ba   :  { %750 = vmatpush.msrb.mxu1 %v705_v10 }
 0x5bc   :  { %751 = vmatpush.msrb.mxu1 %v704_v11 }
 0x5bd   :  { %923 = vmatmul.msk.f32.vlgmr.msrb.gmra.mxu1 %vm398_vm6, %v921_v7 }
 0x5be   :  { %816 = vmatpush.msra.mxu1 %v794_v20 }
 0x5c0   :  { %817 = vmatpush.msra.mxu1 %v793_v21 }
 0x62a   :  { %v733_v17 = vpop.f32.mrf.mxu0 }
 0x63a   :  { %v753_v15 = vpop.f32.mrf.mxu1 }
 0x63b   :  { %757 = vrot.lane.b32.xlu1 %v753_v15, %s951_s29 }
 0x643   :  { %837 = vperm.xlu1 %931, %v835_v22  }
 0x6ad   :  { %v758_v18 = vpop.permute.xlu1 %757 }
 0x6ae   :  { %v760_v19 = vsel %vm398_vm6, %v733_v17, %v758_v18 }
 0x6af   :  { %924 = vmatmul.msk.f32.vlgmr.msra.gmra.mxu0 %vm553_vm13, %v760_v19 }
 0x6b5   :  { %v838_v27 = vpop.permute.xlu1 %837 }
 0x6b6   :  { %vm839_vm15 = vcmp.eq.s32.totalorder %v1182_v29, %v838_v27 }
 0x6b7   :  { %v926_v31 = vsel %vm839_vm15, 1.0, %v950_v32 }
 0x72c   :  { %v789_v24 = vpop.f32.mrf.mxu0 }
 0x72d   :  { %v790_v25 = vadd.f32 %v932_v23, %v789_v24 }
 0x72f   :  { %v792_v26 = vmax.f32 %v790_v25, 0.0 }
 0x731   :  { %925 = vmatmul.msk.f32.vlgmr.msra.gmra.mxu1 %vm398_vm6, %v792_v26 }
 0x7ae   :  { %v819_v30 = vpop.f32.mrf.mxu1 }
 0x7af   :  { %v820_v34 = vadd.f32 %v933_v28, %v819_v30 }
 0x7b1   :  { %v823_v36 = vsel %vm822_vm0, %v820_v34, -inf  ;;  %v842_v38 = vmul.f32 %v926_v31, %v820_v34 }
 0x7b2   :  { %824 = vmax.xlane.f32.xlu2 %v823_v36 }
 0x7b3   :  { %v843_v33 = vsel %vm822_vm0, %v842_v38, 0.0 }
 0x7b4   :  { %844 = vadd.xlane.f32.xlu0 %v843_v33 }
 0x825   :  { %v825_v35 = vpop.xlane.xlu2 %824 }
 0x826   :  { %v826_v37 = vsub.f32 %v820_v34, %v825_v35 }
 0x827   :  { %v845_v32 = vpop.xlane.xlu0 %844 }
 0x828   :  { %v827_v39 = vmul.f32 1.442695, %v826_v37 }
 0x82a   :  { %946 = vpow2.f32 %v827_v39 }
 0x830   :  { %v947_v40 = vpop.eup %946 }
 0x831   :  { %v829_v41 = vsel %vm822_vm0, %v947_v40, 0.0 }
 0x832   :  { %830 = vadd.xlane.f32.xlu1 %v829_v41 }
 0x8a5   :  { %v831_v42 = vpop.xlane.xlu1 %830 }
 0x8a6   :  { %948 = vlog2.f32 %v831_v42 }
 0x8ac   :  { %v949_v29 = vpop.eup %948 }
 0x8ad   :  { %v833_v43 = vmul.f32 0.6931472, %v949_v29 }
 0x8af   :  { %v834_v44 = vadd.f32 %v833_v43, %v825_v35 }
 0x8b1   :  { %v846_v45 = vsub.f32 %v834_v44, %v845_v32 }
 0x8b3   :  { %v848_v46 = vsel %vm847_vm1, %v846_v45, 0.0 }
 0x8b4   :  { %v849_v47 = vrot.slane %v848_v46, 4 }
 0x8b6   :  { %v850_v48 = vadd.f32 %v849_v47, %v848_v46 }
 0x8b8   :  { %v851_v49 = vrot.slane %v850_v48, 2 }
 0x8ba   :  { %v852_v50 = vadd.f32 %v851_v49, %v850_v48 }
 0x8bc   :  { %v853_v51 = vrot.slane %v852_v50, 1 }
 0x8be   :  { %v854_v52 = vadd.f32 %v853_v51, %v852_v50 }
 0x8c0   :  { %v855_v53 = vmul.f32 0.25, %v854_v52 }
 0x8c2   :  { %v856_v54 = vsel %vm847_vm1, %v820_v34, %v855_v53 }
 0x8c3   :  { %858 = vst.msk [vmem:[%s1301_s13] sm:$0x1f] %vm857_vm2, %v856_v54 }

</bundles_post_ra>
